<compile_context>
chip_gen: v5e
topology: v5e:2x2
jax: 0.10.0
libtpu: 0.0.40
codegen_flags: <defaults>
</compile_context>

<pallas_src>
import functools

import jax
import jax.numpy as jnp
from jax import lax
from jax.experimental import pallas as pl
from jax.experimental.pallas import tpu as pltpu

LANES = 128
TILE_ROWS = 1024     # 512 KiB f32 per input block; 2 streams x 2 buffers ~= 2 MiB VMEM
NUM_CHUNKS = 8       # leading "parallel" grid axis (megacore sharding on v7x)


def _make_bce_sum_kernel(total, tile_rows, n_inner, needs_mask):
    """Builds a kernel accumulating per-lane partial BCE sums per chunk."""

    def kernel(x_ref, t_ref, o_ref):
        i = pl.program_id(1)

        @pl.when(i == 0)
        def _():
            o_ref[...] = jnp.zeros_like(o_ref)

        x = x_ref[...].astype(jnp.float32)
        t = t_ref[...].astype(jnp.float32)

        # BCE in logits form: softplus(x) - t*x  (numerically stable).
        bce = jnp.maximum(x, 0.0) - t * x + jnp.log1p(jnp.exp(-jnp.abs(x)))

        if needs_mask:
            # Zero contributions from padded / out-of-bounds / duplicated-tile
            # elements. `total` is static; only comparisons + one select per elem.
            tile_idx = pl.program_id(0) * n_inner + i
            row0 = tile_idx * tile_rows
            shape = (tile_rows, LANES)
            row_idx = row0 + lax.broadcasted_iota(jnp.int32, shape, 0)
            lane_idx = lax.broadcasted_iota(jnp.int32, shape, 1)
            full_rows = total // LANES
            rem = total % LANES
            mask = (row_idx < full_rows) | ((row_idx == full_rows) & (lane_idx < rem))
            bce = jnp.where(mask, bce, 0.0)

        # Lane-dense per-chunk partial sum; cross-lane reduce deferred to JAX.
        o_ref[...] += jnp.sum(bce, axis=0, keepdims=True).reshape(1, 1, LANES)

    return kernel


@functools.partial(jax.jit, static_argnames=("alpha", "gamma", "smooth"))
def focal_loss(inputs, targets, alpha=0.8, gamma=2, smooth=1):
    del smooth  # present in the reference signature, unused by its forward
    total = inputs.size
    if total == 0:
        # TODO(synk): PyTorch's mean-BCE over an empty tensor returns nan; we return 0.
        return jnp.float32(0.0)

    x = jnp.reshape(inputs, (-1,))
    t = jnp.reshape(targets, (-1,))

    # Pad only the sub-128-element ragged tail so the flat array reshapes to a
    # lane-dense [rows, 128] slab. When total % 128 == 0 this is a free reshape.
    rows = pl.cdiv(total, LANES)
    pad = rows * LANES - total
    if pad:
        x = jnp.pad(x, (0, pad))
        t = jnp.pad(t, (0, pad))
    x2 = x.reshape(rows, LANES)
    t2 = t.reshape(rows, LANES)

    tile_rows = min(TILE_ROWS, rows)             # full-extent block if array is small
    n_tiles = pl.cdiv(rows, tile_rows)
    n_outer = max(1, min(NUM_CHUNKS, n_tiles))   # "parallel" chunks (both TCs on v7x)
    n_inner = pl.cdiv(n_tiles, n_outer)          # "arbitrary" reduction axis

    needs_mask = (pad != 0) or (rows % tile_rows != 0) or (n_outer * n_inner != n_tiles)

    def in_map(o, i):
        # Clamp over-covering (o, i) slots to the last real tile; the kernel's
        # element mask zeroes their contribution, so re-reading it is harmless.
        return (jnp.minimum(o * n_inner + i, n_tiles - 1), 0)

    in_spec = pl.BlockSpec((tile_rows, LANES), in_map)
    kernel = _make_bce_sum_kernel(total, tile_rows, n_inner, needs_mask)

    partials = pl.pallas_call(
        kernel,
        out_shape=jax.ShapeDtypeStruct((n_outer, 1, LANES), jnp.float32),
        grid_spec=pltpu.PrefetchScalarGridSpec(
            num_scalar_prefetch=0,
            grid=(n_outer, n_inner),
            in_specs=[in_spec, in_spec],
            out_specs=pl.BlockSpec((1, 1, LANES), lambda o, i: (o, 0, 0)),
        ),
        compiler_params=pltpu.CompilerParams(
            dimension_semantics=("parallel", "arbitrary")),
    )(x2, t2)

    bce_mean = jnp.sum(partials) / jnp.float32(total)
    bce_exp = jnp.exp(-bce_mean)
    return alpha * (1.0 - bce_exp) ** gamma * bce_mean


def _focal_ref(inputs, targets, alpha=0.8, gamma=2):
    """Pure-JAX reference mirroring PyTorch (sigmoid + clamped-log BCE mean)."""
    p = jax.nn.sigmoid(inputs.astype(jnp.float32)).reshape(-1)
    t = targets.astype(jnp.float32).reshape(-1)
    bce = -(t * jnp.maximum(jnp.log(p), -100.0)
            + (1.0 - t) * jnp.maximum(jnp.log(1.0 - p), -100.0)).mean()
    return alpha * (1.0 - jnp.exp(-bce)) ** gamma * bce


if __name__ == "__main__":
    key = jax.random.PRNGKey(0)

    cases = [
        (2, 4, 16, 16),     # aligned NCHW segmenter head (no masking path)
        (3, 5, 7, 11),      # ragged size: tail pad + in-kernel lane masking
        (2, 4, 128, 160),   # multi-tile grid: parallel chunks + partial last block
    ]
    loss = None
    for shape in cases:
        key, k1, k2 = jax.random.split(key, 3)
        x = jax.random.normal(k1, shape, dtype=jnp.float32)
        tgt = (jax.random.uniform(k2, shape) > 0.5).astype(jnp.float32)
        loss = focal_loss(x, tgt, alpha=0.8, gamma=2, smooth=1)
        jax.block_until_ready(loss)
        ref = _focal_ref(x, tgt)
        assert jnp.allclose(loss, ref, rtol=1e-4, atol=1e-6), (shape, loss, ref)

    print("KERNEL_OK")
</pallas_src>

<mosaic_0001>
module attributes {stable_mosaic.version = 11 : i64} {
  func.func @kernel(%arg0: i32, %arg1: i32, %arg2: memref<16x128xf32, #tpu.memory_space<vmem>>, %arg3: memref<16x128xf32, #tpu.memory_space<vmem>>, %arg4: memref<1x1x128xf32, #tpu.memory_space<vmem>>) attributes {dimension_semantics = [#tpu.dimension_semantics<parallel>, #tpu.dimension_semantics<arbitrary>], iteration_bounds = array<i64: 1, 1>, scalar_prefetch = 0 : i64, scratch_operands = 0 : i64, tpu.core_type = #tpu.core_type<tc>, window_params = [{transform_indices = @transform_0, window_bounds = array<i64: 16, 128>}, {transform_indices = @transform_1, window_bounds = array<i64: 16, 128>}, {transform_indices = @transform_2, window_bounds = array<i64: 1, 1, 128>}]} {
    %c0_i32 = arith.constant 0 : i32
    %0 = arith.cmpi eq, %arg1, %c0_i32 : i32
    %1 = arith.extui %0 : i1 to i32
    %c0_i32_0 = arith.constant 0 : i32
    %2 = arith.cmpi ne, %1, %c0_i32_0 : i32
    scf.if %2 {
      %cst_12 = arith.constant 0.000000e+00 : f32
      %21 = vector.broadcast %cst_12 : f32 to vector<1x1x128xf32>
      %c0_13 = arith.constant 0 : index
      %c0_14 = arith.constant 0 : index
      %c0_15 = arith.constant 0 : index
      %22 = vector.load %arg4[%c0_13, %c0_14, %c0_15] : memref<1x1x128xf32, #tpu.memory_space<vmem>>, vector<1x1x128xf32>
      tpu.vector_store %arg4[%c0_13, %c0_14, %c0_15], %21 {strides = array<i32>} : memref<1x1x128xf32, #tpu.memory_space<vmem>>, vector<1x1x128xf32>,
    } else {
    }
    %c0 = arith.constant 0 : index
    %c0_1 = arith.constant 0 : index
    %3 = vector.load %arg2[%c0, %c0_1] : memref<16x128xf32, #tpu.memory_space<vmem>>, vector<16x128xf32>
    %c0_2 = arith.constant 0 : index
    %c0_3 = arith.constant 0 : index
    %4 = vector.load %arg3[%c0_2, %c0_3] : memref<16x128xf32, #tpu.memory_space<vmem>>, vector<16x128xf32>
    %cst = arith.constant 0.000000e+00 : f32
    %5 = vector.broadcast %cst : f32 to vector<16x128xf32>
    %6 = arith.maximumf %3, %5 : vector<16x128xf32>
    %7 = arith.mulf %4, %3 : vector<16x128xf32>
    %8 = arith.subf %6, %7 : vector<16x128xf32>
    %9 = math.absf %3 : vector<16x128xf32>
    %cst_4 = arith.constant 0.000000e+00 : f32
    %10 = vector.broadcast %cst_4 : f32 to vector<16x128xf32>
    %11 = arith.subf %10, %9 : vector<16x128xf32>
    %12 = math.exp %11 : vector<16x128xf32>
    %13 = math.log1p %12 : vector<16x128xf32>
    %14 = arith.addf %8, %13 : vector<16x128xf32>
    %c0_5 = arith.constant 0 : index
    %c0_6 = arith.constant 0 : index
    %c0_7 = arith.constant 0 : index
    %15 = vector.load %arg4[%c0_5, %c0_6, %c0_7] : memref<1x1x128xf32, #tpu.memory_space<vmem>>, vector<1x1x128xf32>
    %cst_8 = arith.constant dense<0.000000e+00> : vector<128xf32>
    %16 = vector.multi_reduction <add>, %14, %cst_8 [0] : vector<16x128xf32> to vector<128xf32>
    %17 = vector.shape_cast %16 : vector<128xf32> to vector<1x128xf32>
    %18 = vector.shape_cast %17 : vector<1x128xf32> to vector<1x1x128xf32>
    %19 = arith.addf %15, %18 : vector<1x1x128xf32>
    %c0_9 = arith.constant 0 : index
    %c0_10 = arith.constant 0 : index
    %c0_11 = arith.constant 0 : index
    %20 = vector.load %arg4[%c0_9, %c0_10, %c0_11] : memref<1x1x128xf32, #tpu.memory_space<vmem>>, vector<1x1x128xf32>
    tpu.vector_store %arg4[%c0_9, %c0_10, %c0_11], %19 {strides = array<i32>} : memref<1x1x128xf32, #tpu.memory_space<vmem>>, vector<1x1x128xf32>,
    return
  }
  func.func @transform_0(%arg0: i32, %arg1: i32) -> (i32, i32) {
    %c1_i32 = arith.constant 1 : i32
    %0 = arith.muli %arg0, %c1_i32 : i32
    %1 = arith.addi %0, %arg1 : i32
    %c0_i32 = arith.constant 0 : i32
    %2 = arith.minsi %1, %c0_i32 : i32
    %c0_i32_0 = arith.constant 0 : i32
    %c0_i32_1 = arith.constant 0 : i32
    return %2, %c0_i32_0 : i32, i32
  }
  func.func @transform_1(%arg0: i32, %arg1: i32) -> (i32, i32) {
    %c1_i32 = arith.constant 1 : i32
    %0 = arith.muli %arg0, %c1_i32 : i32
    %1 = arith.addi %0, %arg1 : i32
    %c0_i32 = arith.constant 0 : i32
    %2 = arith.minsi %1, %c0_i32 : i32
    %c0_i32_0 = arith.constant 0 : i32
    %c0_i32_1 = arith.constant 0 : i32
    return %2, %c0_i32_0 : i32, i32
  }
  func.func @transform_2(%arg0: i32, %arg1: i32) -> (i32, i32, i32) {
    %c0_i32 = arith.constant 0 : i32
    %c0_i32_0 = arith.constant 0 : i32
    %c0_i32_1 = arith.constant 0 : i32
    return %arg0, %c0_i32, %c0_i32_0 : i32, i32, i32
  }
}

</mosaic_0001>

<bundles_post_ra>
// kernel: focal_loss.1
= control target key start
LH: loop header
LB: loop body
LE: loop exit
PB: predicated region body
PF: predicated region fallthrough
CT: control target
= control target key end

     0   :  { %v153_v0 = vmov 0.0   ;;  %s190_s2 = inlined_call_operand.vmem [shape: f32[1,1,128], index: 2, kind: output, shape index: {}]   ;;  %s191_s0 = inlined_call_operand.vmem [shape: f32[16,128], index: 0, kind: input, shape index: {}]   ;;  %s192_s1 = inlined_call_operand.vmem [shape: f32[16,128], index: 1, kind: input, shape index: {}]  }
   0x1   :  { %79 = vst [vmem:[%s190_s2] sm:$0x1] %v153_v0  ;;  %v80_v1 = vld [vmem:[%s191_s0] sm:$0xff]  ;;  %v81_v2 = vld [vmem:[%s191_s0 + $0x8] sm:$0xff] }
   0x2   :  { %v90_v3 = vand.u32 2147483647, %v80_v1  ;;  %v91_v4 = vand.u32 2147483647, %v81_v2  ;;  %v82_v13 = vld [vmem:[%s192_s1] sm:$0xff]  ;;  %v83_v16 = vld [vmem:[%s192_s1 + $0x8] sm:$0xff] }
   0x3   :  { %v84_v18 = vmax.f32 %v80_v1, 0.0  ;;  %v86_v19 = vmul.f32 %v82_v13, %v80_v1  ;;  %v85_v22 = vmax.f32 %v81_v2, 0.0  ;;  %v87_v23 = vmul.f32 %v83_v16, %v81_v2 }
   0x4   :  { %v92_v5 = vsub.f32 0.0, %v90_v3  ;;  %v93_v6 = vsub.f32 0.0, %v91_v4 }
   0x5   :  { %v88_v27 = vsub.f32 %v84_v18, %v86_v19  ;;  %v89_v30 = vsub.f32 %v85_v22, %v87_v23 }
   0x6   :  { %v94_v7 = vmul.f32 1.442695, %v92_v5  ;;  %v96_v8 = vmul.f32 1.442695, %v93_v6 }
   0x8   :  { %145 = vpow2.f32 %v94_v7  ;;  %v118_v43 = vld [vmem:[%s190_s2] sm:$0x1] }
   0x9   :  { %147 = vpow2.f32 %v96_v8 }
   0xe   :  { %v146_v9 = vpop.eup %145 }
   0xf   :  { %v148_v10 = vpop.eup %147  ;;  %v98_v11 = vadd.f32 1.0, %v146_v9  ;;  %v101_v12 = vmul.f32 -0.5, %v146_v9  ;;  %v104_v20 = vand.u32 2147483647, %v146_v9 }
  0x10   :  { %v107_v14 = vadd.f32 1.0, %v148_v10  ;;  %v110_v15 = vmul.f32 -0.5, %v148_v10  ;;  %v113_v24 = vand.u32 2147483647, %v148_v10 }
  0x11   :  { %149 = vlog2.f32 %v98_v11  ;;  %v102_v17 = vadd.f32 1.0, %v101_v12  ;;  %vm105_vm0 = vcmp.lt.f32.partialorder %v104_v20, 0.0004427343 }
  0x12   :  { %151 = vlog2.f32 %v107_v14  ;;  %v111_v21 = vadd.f32 1.0, %v110_v15  ;;  %vm114_vm1 = vcmp.lt.f32.partialorder %v113_v24, 0.0004427343 }
  0x13   :  { %v103_v25 = vmul.f32 %v146_v9, %v102_v17 }
  0x14   :  { %v112_v28 = vmul.f32 %v148_v10, %v111_v21 }
  0x17   :  { %v150_v26 = vpop.eup %149 }
  0x18   :  { %v152_v29 = vpop.eup %151  ;;  %v100_v31 = vmul.f32 0.6931472, %v150_v26 }
  0x19   :  { %v109_v32 = vmul.f32 0.6931472, %v152_v29 }
  0x1a   :  { %v106_v33 = vsel %vm105_vm0, %v103_v25, %v100_v31 }
  0x1b   :  { %v115_v34 = vsel %vm114_vm1, %v112_v28, %v109_v32  ;;  %v116_v35 = vadd.f32 %v106_v33, %v88_v27 }
  0x1c   :  { %v117_v36 = vadd.f32 %v115_v34, %v89_v30 }
  0x1e   :  { %v119_v37 = vadd.f32 %v117_v36, %v116_v35 }
  0x20   :  { %v120_v38 = vrot.slane %v119_v37, 4 }
  0x22   :  { %v121_v39 = vadd.f32 %v120_v38, %v119_v37 }
  0x24   :  { %v122_v40 = vrot.slane %v121_v39, 2 }
  0x26   :  { %v123_v41 = vadd.f32 %v122_v40, %v121_v39 }
  0x28   :  { %v124_v42 = vrot.slane %v123_v41, 1 }
  0x2a   :  { %v125_v44 = vadd.f32 %v124_v42, %v123_v41 }
  0x2c   :  { %v126_v45 = vadd.f32 %v125_v44, %v118_v43 }
  0x2e   :  { %127 = vst [vmem:[%s190_s2] sm:$0x1] %v126_v45 }

</bundles_post_ra>
